<compile_context>
chip_gen: v6e
topology: v6e:2x2x1
jax: 0.10.0
libtpu: 0.0.40
codegen_flags: <defaults>
</compile_context>

<pallas_src>
import functools
import math

import jax
import jax.numpy as jnp
from jax import lax
from jax.experimental import pallas as pl
from jax.experimental.pallas import tpu as pltpu

# Large finite negative value used for masked scores and the running-max init.
# exp(_MASK_VALUE - anything_reasonable) underflows to exactly 0.0f, so masked
# entries get exactly zero probability without introducing inf/nan.
_MASK_VALUE = -0.7 * float(jnp.finfo(jnp.float32).max)


def _flash_attention_kernel(q_ref, k_ref, v_ref, o_ref, m_ref, l_ref, acc_ref,
                            *, scale, mask_flag, tq, tk):
    """One grid step: (batch b, query-block qi, key/value-block ki).

    q_ref: (1, H, tq, E)   k_ref: (1, H, tk, E)   v_ref: (1, H, tk, D)
    o_ref: (1, H, tq, D)
    m_ref, l_ref: (H, tq, 1) f32 running max / softmax normalizer
    acc_ref:      (H, tq, D) f32 running numerator
    """
    qi = pl.program_id(1)
    ki = pl.program_id(2)

    @pl.when(ki == 0)
    def _init():
        m_ref[...] = jnp.full(m_ref.shape, _MASK_VALUE, dtype=m_ref.dtype)
        l_ref[...] = jnp.zeros(l_ref.shape, dtype=l_ref.dtype)
        acc_ref[...] = jnp.zeros(acc_ref.shape, dtype=acc_ref.dtype)

    def _attend(apply_mask):
        q = q_ref[0]      # (H, tq, E), input dtype
        k = k_ref[0]      # (H, tk, E)
        v = v_ref[0]      # (H, tk, D)

        # Batched-over-heads Q @ K^T on the MXU with f32 accumulation.
        s = jnp.einsum("hqe,hke->hqk", q, k,
                       preferred_element_type=jnp.float32) * scale
        if apply_mask:
            # Only diagonal-straddling blocks pay for the iota mask.
            row = qi * tq + lax.broadcasted_iota(jnp.int32, (tq, tk), 0)
            col = ki * tk + lax.broadcasted_iota(jnp.int32, (tq, tk), 1)
            s = jnp.where((col <= row)[None, :, :], s, _MASK_VALUE)

        m_prev = m_ref[...]                                       # (H, tq, 1)
        m_new = jnp.maximum(m_prev, jnp.max(s, axis=-1, keepdims=True))
        alpha = jnp.exp(m_prev - m_new)
        p = jnp.exp(s - m_new)                                    # (H, tq, tk) f32

        l_ref[...] = alpha * l_ref[...] + jnp.sum(p, axis=-1, keepdims=True)
        acc_ref[...] = alpha * acc_ref[...] + jnp.einsum(
            "hqk,hkd->hqd", p.astype(v.dtype), v,
            preferred_element_type=jnp.float32)
        m_ref[...] = m_new

    if mask_flag:
        q0 = qi * tq
        k0 = ki * tk
        fully_visible = (k0 + (tk - 1)) <= q0      # block entirely on/below diag
        fully_masked = k0 > (q0 + (tq - 1))        # block entirely above diag

        @pl.when(fully_visible)
        def _visible():
            _attend(False)

        @pl.when(jnp.logical_not(jnp.logical_or(fully_visible, fully_masked)))
        def _diagonal():
            _attend(True)
        # Fully-masked blocks: skip all compute (they contribute nothing).
    else:
        _attend(False)

    @pl.when(ki == pl.num_programs(2) - 1)
    def _finalize():
        inv_l = 1.0 / l_ref[...]                                  # exact, f32
        o_ref[0] = (acc_ref[...] * inv_l).astype(o_ref.dtype)


def _pick_tile(n, preferred):
    """Largest multiple of 8 that divides n and is <= preferred, else n (full)."""
    if n <= preferred:
        return n
    best = None
    t = 8
    while t <= preferred:
        if n % t == 0:
            best = t
        t += 8
    return best if best is not None else n


def full_attention(queries, keys, values, attn_mask=None, *, mask_flag=True,
                   scale=None, block_q=128, block_k=128):
    """Pallas implementation of Informer FullAttention.forward (eval mode).

    queries: (B, L, H, E), keys: (B, S, H, E), values: (B, S, H, D)
    returns: (B, L, H, D)
    """
    # TODO(synk): attention dropout (train-mode) and externally supplied
    # attn_mask tensors are not implemented; only the default causal mask path.
    if attn_mask is not None:
        raise NotImplementedError("only attn_mask=None (causal) is supported")

    B, L, H, E = queries.shape
    _, S, _, D = values.shape
    if mask_flag and L != S:
        raise ValueError("causal mask requires L == S")
    scale = float(scale) if scale is not None else 1.0 / math.sqrt(E)

    # (B, L, H, E) -> (B, H, L, E): one cheap XLA transpose per operand so every
    # kernel tile is a contiguous (H, seq, feature) slab -- no sub-lane slicing
    # inside the kernel.
    qT = jnp.transpose(queries, (0, 2, 1, 3))
    kT = jnp.transpose(keys, (0, 2, 1, 3))
    vT = jnp.transpose(values, (0, 2, 1, 3))

    tq = _pick_tile(L, block_q)
    tk = _pick_tile(S, block_k)
    if mask_flag:
        tq = tk = min(tq, tk)   # equal q/kv tiles keep the causal block skip tight
    n_q = L // tq
    n_kv = S // tk

    kernel = functools.partial(_flash_attention_kernel, scale=scale,
                               mask_flag=mask_flag, tq=tq, tk=tk)

    # VMEM budget: double-buffered input/output blocks + f32 accumulators,
    # padded to (8, 128) tiles; capped at 64 MiB so it is also safe on v7x.
    def _pad(x, m):
        return ((x + m - 1) // m) * m

    in_bytes = jnp.dtype(queries.dtype).itemsize
    blk_bytes = (H * _pad(tq, 8) * _pad(E, 128)
                 + H * _pad(tk, 8) * _pad(E, 128)
                 + H * _pad(tk, 8) * _pad(D, 128)
                 + H * _pad(tq, 8) * _pad(D, 128)) * in_bytes
    scratch_bytes = H * _pad(tq, 8) * (2 * 128 + _pad(D, 128)) * 4
    est = 2 * blk_bytes + scratch_bytes
    vmem_limit = int(min(max(2 * est, 32 * 1024 * 1024), 64 * 1024 * 1024))

    outT = pl.pallas_call(
        kernel,
        out_shape=jax.ShapeDtypeStruct((B, H, L, D), queries.dtype),
        grid=(B, n_q, n_kv),
        in_specs=[
            pl.BlockSpec((1, H, tq, E), lambda b, qi, ki: (b, 0, qi, 0)),
            pl.BlockSpec((1, H, tk, E), lambda b, qi, ki: (b, 0, ki, 0)),
            pl.BlockSpec((1, H, tk, D), lambda b, qi, ki: (b, 0, ki, 0)),
        ],
        out_specs=pl.BlockSpec((1, H, tq, D), lambda b, qi, ki: (b, 0, qi, 0)),
        scratch_shapes=[
            pltpu.VMEM((H, tq, 1), jnp.float32),   # running max
            pltpu.VMEM((H, tq, 1), jnp.float32),   # running normalizer
            pltpu.VMEM((H, tq, D), jnp.float32),   # running numerator
        ],
        compiler_params=pltpu.CompilerParams(
            dimension_semantics=("parallel", "parallel", "arbitrary"),
            vmem_limit_bytes=vmem_limit,
        ),
    )(qT, kT, vT)

    # Back to the PyTorch output layout (B, L, H, D).
    return jnp.transpose(outT, (0, 2, 1, 3))


def _reference(queries, keys, values, scale=None, mask_flag=True):
    B, L, H, E = queries.shape
    _, S, _, D = values.shape
    scale = scale if scale is not None else 1.0 / math.sqrt(E)
    q = queries.astype(jnp.float32)
    k = keys.astype(jnp.float32)
    v = values.astype(jnp.float32)
    scores = jnp.einsum("blhe,bshe->bhls", q, k,
                        precision=lax.Precision.HIGHEST)
    if mask_flag:
        causal = jnp.triu(jnp.ones((L, S), dtype=bool), k=1)
        scores = jnp.where(causal[None, None], -jnp.inf, scores)
    a = jax.nn.softmax(scale * scores, axis=-1)
    return jnp.einsum("bhls,bshd->blhd", a, v,
                      precision=lax.Precision.HIGHEST)


if __name__ == "__main__":
    # Test 1: small shapes consistent with the module (single-block path).
    B, L, S, H, E, D = 2, 8, 8, 4, 32, 32
    kq, kk, kv = jax.random.split(jax.random.PRNGKey(0), 3)
    q = jax.random.normal(kq, (B, L, H, E), dtype=jnp.float32)
    k = jax.random.normal(kk, (B, S, H, E), dtype=jnp.float32)
    v = jax.random.normal(kv, (B, S, H, D), dtype=jnp.float32)

    out = jax.block_until_ready(
        full_attention(q, k, v, attn_mask=None, mask_flag=True))
    ref = _reference(q, k, v, mask_flag=True)
    assert out.shape == (B, L, H, D)
    err1 = float(jnp.max(jnp.abs(out.astype(jnp.float32) - ref)))
    assert err1 < 2e-2, f"test1 max abs err {err1}"

    # Test 2: exercises the tiled flash path (2x2 q/kv blocks, causal skip).
    B2, L2, H2, E2, D2 = 1, 256, 2, 32, 32
    kq2, kk2, kv2 = jax.random.split(jax.random.PRNGKey(1), 3)
    q2 = jax.random.normal(kq2, (B2, L2, H2, E2), dtype=jnp.float32)
    k2 = jax.random.normal(kk2, (B2, L2, H2, E2), dtype=jnp.float32)
    v2 = jax.random.normal(kv2, (B2, L2, H2, D2), dtype=jnp.float32)
    out2 = jax.block_until_ready(
        full_attention(q2, k2, v2, mask_flag=True, block_q=128, block_k=128))
    ref2 = _reference(q2, k2, v2, mask_flag=True)
    err2 = float(jnp.max(jnp.abs(out2.astype(jnp.float32) - ref2)))
    assert err2 < 2e-2, f"test2 max abs err {err2}"

    # Test 3: bf16 operands go straight to the MXU with f32 accumulation.
    qb = q2.astype(jnp.bfloat16)
    kb = k2.astype(jnp.bfloat16)
    vb = v2.astype(jnp.bfloat16)
    out3 = jax.block_until_ready(
        full_attention(qb, kb, vb, mask_flag=True, block_q=128, block_k=128))
    ref3 = _reference(qb, kb, vb, mask_flag=True)
    err3 = float(jnp.max(jnp.abs(out3.astype(jnp.float32) - ref3)))
    assert err3 < 6e-2, f"test3 max abs err {err3}"

    print("KERNEL_OK")
</pallas_src>

<mosaic_0001>
module attributes {stable_mosaic.version = 11 : i64} {
  func.func @_flash_attention_kernel(%arg0: i32, %arg1: i32, %arg2: i32, %arg3: memref<1x4x8x32xf32, #tpu.memory_space<vmem>>, %arg4: memref<1x4x8x32xf32, #tpu.memory_space<vmem>>, %arg5: memref<1x4x8x32xf32, #tpu.memory_space<vmem>>, %arg6: memref<1x4x8x32xf32, #tpu.memory_space<vmem>>, %arg7: memref<4x8x1xf32, #tpu.memory_space<vmem>>, %arg8: memref<4x8x1xf32, #tpu.memory_space<vmem>>, %arg9: memref<4x8x32xf32, #tpu.memory_space<vmem>>) attributes {dimension_semantics = [#tpu.dimension_semantics<parallel>, #tpu.dimension_semantics<parallel>, #tpu.dimension_semantics<arbitrary>], iteration_bounds = array<i64: 2, 1, 1>, scalar_prefetch = 0 : i64, scratch_operands = 3 : i64, tpu.core_type = #tpu.core_type<tc>, window_params = [{transform_indices = @transform_0, window_bounds = array<i64: 1, 4, 8, 32>}, {transform_indices = @transform_1, window_bounds = array<i64: 1, 4, 8, 32>}, {transform_indices = @transform_2, window_bounds = array<i64: 1, 4, 8, 32>}, {transform_indices = @transform_3, window_bounds = array<i64: 1, 4, 8, 32>}]} {
    %c0_i32 = arith.constant 0 : i32
    %0 = arith.cmpi eq, %arg2, %c0_i32 : i32
    %1 = arith.extui %0 : i1 to i32
    %c0_i32_0 = arith.constant 0 : i32
    %2 = arith.cmpi ne, %1, %c0_i32_0 : i32
    scf.if %2 {
      %cst = arith.constant -2.38197633E+38 : f32
      %18 = vector.broadcast %cst : f32 to vector<4x8x1xf32>
      %c0 = arith.constant 0 : index
      %c0_7 = arith.constant 0 : index
      %c0_8 = arith.constant 0 : index
      %19 = vector.load %arg7[%c0, %c0_7, %c0_8] : memref<4x8x1xf32, #tpu.memory_space<vmem>>, vector<4x8x1xf32>
      tpu.vector_store %arg7[%c0, %c0_7, %c0_8], %18 {strides = array<i32>} : memref<4x8x1xf32, #tpu.memory_space<vmem>>, vector<4x8x1xf32>,
      %cst_9 = arith.constant 0.000000e+00 : f32
      %20 = vector.broadcast %cst_9 : f32 to vector<4x8x1xf32>
      %c0_10 = arith.constant 0 : index
      %c0_11 = arith.constant 0 : index
      %c0_12 = arith.constant 0 : index
      %21 = vector.load %arg8[%c0_10, %c0_11, %c0_12] : memref<4x8x1xf32, #tpu.memory_space<vmem>>, vector<4x8x1xf32>
      tpu.vector_store %arg8[%c0_10, %c0_11, %c0_12], %20 {strides = array<i32>} : memref<4x8x1xf32, #tpu.memory_space<vmem>>, vector<4x8x1xf32>,
      %cst_13 = arith.constant 0.000000e+00 : f32
      %22 = vector.broadcast %cst_13 : f32 to vector<4x8x32xf32>
      %c0_14 = arith.constant 0 : index
      %c0_15 = arith.constant 0 : index
      %c0_16 = arith.constant 0 : index
      %23 = vector.load %arg9[%c0_14, %c0_15, %c0_16] : memref<4x8x32xf32, #tpu.memory_space<vmem>>, vector<4x8x32xf32>
      tpu.vector_store %arg9[%c0_14, %c0_15, %c0_16], %22 {strides = array<i32>} : memref<4x8x32xf32, #tpu.memory_space<vmem>>, vector<4x8x32xf32>,
    } else {
    }
    %c8_i32 = arith.constant 8 : i32
    %3 = arith.muli %arg1, %c8_i32 : i32
    %c8_i32_1 = arith.constant 8 : i32
    %4 = arith.muli %arg2, %c8_i32_1 : i32
    %c7_i32 = arith.constant 7 : i32
    %5 = arith.addi %4, %c7_i32 : i32
    %6 = arith.cmpi sle, %5, %3 : i32
    %c7_i32_2 = arith.constant 7 : i32
    %7 = arith.addi %3, %c7_i32_2 : i32
    %8 = arith.cmpi sgt, %4, %7 : i32
    %9 = arith.extui %6 : i1 to i32
    %c0_i32_3 = arith.constant 0 : i32
    %10 = arith.cmpi ne, %9, %c0_i32_3 : i32
    scf.if %10 {
      %c0 = arith.constant 0 : index
      %c0_7 = arith.constant 0 : index
      %c0_8 = arith.constant 0 : index
      %c0_9 = arith.constant 0 : index
      %18 = vector.load %arg3[%c0, %c0_7, %c0_8, %c0_9] : memref<1x4x8x32xf32, #tpu.memory_space<vmem>>, vector<1x4x8x32xf32>
      %19 = vector.shape_cast %18 : vector<1x4x8x32xf32> to vector<4x8x32xf32>
      %c0_10 = arith.constant 0 : index
      %c0_11 = arith.constant 0 : index
      %c0_12 = arith.constant 0 : index
      %c0_13 = arith.constant 0 : index
      %20 = vector.load %arg4[%c0_10, %c0_11, %c0_12, %c0_13] : memref<1x4x8x32xf32, #tpu.memory_space<vmem>>, vector<1x4x8x32xf32>
      %21 = vector.shape_cast %20 : vector<1x4x8x32xf32> to vector<4x8x32xf32>
      %c0_14 = arith.constant 0 : index
      %c0_15 = arith.constant 0 : index
      %c0_16 = arith.constant 0 : index
      %c0_17 = arith.constant 0 : index
      %22 = vector.load %arg5[%c0_14, %c0_15, %c0_16, %c0_17] : memref<1x4x8x32xf32, #tpu.memory_space<vmem>>, vector<1x4x8x32xf32>
      %23 = vector.shape_cast %22 : vector<1x4x8x32xf32> to vector<4x8x32xf32>
      "tpu.trace_start"() <{level = 10 : i32, message = "hqe,hke->hqk"}> : () -> ()
      %cst = arith.constant dense<0.000000e+00> : vector<4x8x8xf32>
      %24 = tpu.matmul %19, %21, %cst {dimension_numbers = #tpu.dot_dimension_numbers<[2], [2], [1], [1], [0, 0, 0, 1, 1, 1], [0], [0]>} : vector<4x8x32xf32>, vector<4x8x32xf32>, vector<4x8x8xf32> -> vector<4x8x8xf32>
      "tpu.trace_stop"() : () -> ()
      %cst_18 = arith.constant 0.176776692 : f32
      %25 = vector.broadcast %cst_18 : f32 to vector<4x8x8xf32>
      %26 = arith.mulf %24, %25 : vector<4x8x8xf32>
      %c0_19 = arith.constant 0 : index
      %c0_20 = arith.constant 0 : index
      %c0_21 = arith.constant 0 : index
      %27 = vector.load %arg7[%c0_19, %c0_20, %c0_21] : memref<4x8x1xf32, #tpu.memory_space<vmem>>, vector<4x8x1xf32>
      %cst_22 = arith.constant dense<0xFF800000> : vector<4x8xf32>
      %28 = vector.multi_reduction <maximumf>, %26, %cst_22 [2] : vector<4x8x8xf32> to vector<4x8xf32>
      %29 = vector.shape_cast %28 : vector<4x8xf32> to vector<4x8x1xf32>
      %30 = arith.maximumf %27, %29 : vector<4x8x1xf32>
      %31 = arith.subf %27, %30 : vector<4x8x1xf32>
      %32 = math.exp %31 : vector<4x8x1xf32>
      %33 = vector.broadcast %30 : vector<4x8x1xf32> to vector<4x8x8xf32>
      %34 = arith.subf %26, %33 : vector<4x8x8xf32>
      %35 = math.exp %34 : vector<4x8x8xf32>
      %c0_23 = arith.constant 0 : index
      %c0_24 = arith.constant 0 : index
      %c0_25 = arith.constant 0 : index
      %36 = vector.load %arg8[%c0_23, %c0_24, %c0_25] : memref<4x8x1xf32, #tpu.memory_space<vmem>>, vector<4x8x1xf32>
      %37 = arith.mulf %32, %36 : vector<4x8x1xf32>
      %cst_26 = arith.constant dense<0.000000e+00> : vector<4x8xf32>
      %38 = vector.multi_reduction <add>, %35, %cst_26 [2] : vector<4x8x8xf32> to vector<4x8xf32>
      %39 = vector.shape_cast %38 : vector<4x8xf32> to vector<4x8x1xf32>
      %40 = arith.addf %37, %39 : vector<4x8x1xf32>
      %c0_27 = arith.constant 0 : index
      %c0_28 = arith.constant 0 : index
      %c0_29 = arith.constant 0 : index
      %41 = vector.load %arg8[%c0_27, %c0_28, %c0_29] : memref<4x8x1xf32, #tpu.memory_space<vmem>>, vector<4x8x1xf32>
      tpu.vector_store %arg8[%c0_27, %c0_28, %c0_29], %40 {strides = array<i32>} : memref<4x8x1xf32, #tpu.memory_space<vmem>>, vector<4x8x1xf32>,
      %c0_30 = arith.constant 0 : index
      %c0_31 = arith.constant 0 : index
      %c0_32 = arith.constant 0 : index
      %42 = vector.load %arg9[%c0_30, %c0_31, %c0_32] : memref<4x8x32xf32, #tpu.memory_space<vmem>>, vector<4x8x32xf32>
      %43 = vector.broadcast %32 : vector<4x8x1xf32> to vector<4x8x32xf32>
      %44 = arith.mulf %43, %42 : vector<4x8x32xf32>
      "tpu.trace_start"() <{level = 10 : i32, message = "hqk,hkd->hqd"}> : () -> ()
      %cst_33 = arith.constant dense<0.000000e+00> : vector<4x8x32xf32>
      %45 = tpu.matmul %35, %23, %cst_33 {dimension_numbers = #tpu.dot_dimension_numbers<[2], [1], [1], [2], [0, 0, 0, 1, 1, 2], [0], [0]>} : vector<4x8x8xf32>, vector<4x8x32xf32>, vector<4x8x32xf32> -> vector<4x8x32xf32>
      "tpu.trace_stop"() : () -> ()
      %46 = arith.addf %44, %45 : vector<4x8x32xf32>
      %c0_34 = arith.constant 0 : index
      %c0_35 = arith.constant 0 : index
      %c0_36 = arith.constant 0 : index
      %47 = vector.load %arg9[%c0_34, %c0_35, %c0_36] : memref<4x8x32xf32, #tpu.memory_space<vmem>>, vector<4x8x32xf32>
      tpu.vector_store %arg9[%c0_34, %c0_35, %c0_36], %46 {strides = array<i32>} : memref<4x8x32xf32, #tpu.memory_space<vmem>>, vector<4x8x32xf32>,
      %c0_37 = arith.constant 0 : index
      %c0_38 = arith.constant 0 : index
      %c0_39 = arith.constant 0 : index
      %48 = vector.load %arg7[%c0_37, %c0_38, %c0_39] : memref<4x8x1xf32, #tpu.memory_space<vmem>>, vector<4x8x1xf32>
      tpu.vector_store %arg7[%c0_37, %c0_38, %c0_39], %30 {strides = array<i32>} : memref<4x8x1xf32, #tpu.memory_space<vmem>>, vector<4x8x1xf32>,
    } else {
    }
    %11 = arith.ori %6, %8 : i1
    %true = arith.constant true
    %12 = arith.xori %11, %true : i1
    %13 = arith.extui %12 : i1 to i32
    %c0_i32_4 = arith.constant 0 : i32
    %14 = arith.cmpi ne, %13, %c0_i32_4 : i32
    scf.if %14 {
      %c0 = arith.constant 0 : index
      %c0_7 = arith.constant 0 : index
      %c0_8 = arith.constant 0 : index
      %c0_9 = arith.constant 0 : index
      %18 = vector.load %arg3[%c0, %c0_7, %c0_8, %c0_9] : memref<1x4x8x32xf32, #tpu.memory_space<vmem>>, vector<1x4x8x32xf32>
      %19 = vector.shape_cast %18 : vector<1x4x8x32xf32> to vector<4x8x32xf32>
      %c0_10 = arith.constant 0 : index
      %c0_11 = arith.constant 0 : index
      %c0_12 = arith.constant 0 : index
      %c0_13 = arith.constant 0 : index
      %20 = vector.load %arg4[%c0_10, %c0_11, %c0_12, %c0_13] : memref<1x4x8x32xf32, #tpu.memory_space<vmem>>, vector<1x4x8x32xf32>
      %21 = vector.shape_cast %20 : vector<1x4x8x32xf32> to vector<4x8x32xf32>
      %c0_14 = arith.constant 0 : index
      %c0_15 = arith.constant 0 : index
      %c0_16 = arith.constant 0 : index
      %c0_17 = arith.constant 0 : index
      %22 = vector.load %arg5[%c0_14, %c0_15, %c0_16, %c0_17] : memref<1x4x8x32xf32, #tpu.memory_space<vmem>>, vector<1x4x8x32xf32>
      %23 = vector.shape_cast %22 : vector<1x4x8x32xf32> to vector<4x8x32xf32>
      "tpu.trace_start"() <{level = 10 : i32, message = "hqe,hke->hqk"}> : () -> ()
      %cst = arith.constant dense<0.000000e+00> : vector<4x8x8xf32>
      %24 = tpu.matmul %19, %21, %cst {dimension_numbers = #tpu.dot_dimension_numbers<[2], [2], [1], [1], [0, 0, 0, 1, 1, 1], [0], [0]>} : vector<4x8x32xf32>, vector<4x8x32xf32>, vector<4x8x8xf32> -> vector<4x8x8xf32>
      "tpu.trace_stop"() : () -> ()
      %cst_18 = arith.constant 0.176776692 : f32
      %25 = vector.broadcast %cst_18 : f32 to vector<4x8x8xf32>
      %26 = arith.mulf %24, %25 : vector<4x8x8xf32>
      %c8_i32_19 = arith.constant 8 : i32
      %27 = arith.muli %arg1, %c8_i32_19 : i32
      %28 = tpu.iota {dimensions = array<i32: 0>} : vector<8x8xi32>
      %29 = vector.broadcast %27 : i32 to vector<8x8xi32>
      %30 = arith.addi %29, %28 : vector<8x8xi32>
      %c8_i32_20 = arith.constant 8 : i32
      %31 = arith.muli %arg2, %c8_i32_20 : i32
      %32 = tpu.iota {dimensions = array<i32: 1>} : vector<8x8xi32>
      %33 = vector.broadcast %31 : i32 to vector<8x8xi32>
      %34 = arith.addi %33, %32 : vector<8x8xi32>
      %35 = arith.cmpi sle, %34, %30 : vector<8x8xi32>
      %36 = vector.shape_cast %35 : vector<8x8xi1> to vector<1x8x8xi1>
      %cst_21 = arith.constant -2.38197633E+38 : f32
      %37 = vector.shape_cast %36 : vector<1x8x8xi1> to vector<1x8x8xi1>
      %38 = vector.broadcast %37 : vector<1x8x8xi1> to vector<4x8x8xi1>
      %39 = vector.broadcast %cst_21 : f32 to vector<4x8x8xf32>
      %40 = arith.select %38, %26, %39 : vector<4x8x8xi1>, vector<4x8x8xf32>
      %c0_22 = arith.constant 0 : index
      %c0_23 = arith.constant 0 : index
      %c0_24 = arith.constant 0 : index
      %41 = vector.load %arg7[%c0_22, %c0_23, %c0_24] : memref<4x8x1xf32, #tpu.memory_space<vmem>>, vector<4x8x1xf32>
      %cst_25 = arith.constant dense<0xFF800000> : vector<4x8xf32>
      %42 = vector.multi_reduction <maximumf>, %40, %cst_25 [2] : vector<4x8x8xf32> to vector<4x8xf32>
      %43 = vector.shape_cast %42 : vector<4x8xf32> to vector<4x8x1xf32>
      %44 = arith.maximumf %41, %43 : vector<4x8x1xf32>
      %45 = arith.subf %41, %44 : vector<4x8x1xf32>
      %46 = math.exp %45 : vector<4x8x1xf32>
      %47 = vector.broadcast %44 : vector<4x8x1xf32> to vector<4x8x8xf32>
      %48 = arith.subf %40, %47 : vector<4x8x8xf32>
      %49 = math.exp %48 : vector<4x8x8xf32>
      %c0_26 = arith.constant 0 : index
      %c0_27 = arith.constant 0 : index
      %c0_28 = arith.constant 0 : index
      %50 = vector.load %arg8[%c0_26, %c0_27, %c0_28] : memref<4x8x1xf32, #tpu.memory_space<vmem>>, vector<4x8x1xf32>
      %51 = arith.mulf %46, %50 : vector<4x8x1xf32>
      %cst_29 = arith.constant dense<0.000000e+00> : vector<4x8xf32>
      %52 = vector.multi_reduction <add>, %49, %cst_29 [2] : vector<4x8x8xf32> to vector<4x8xf32>
      %53 = vector.shape_cast %52 : vector<4x8xf32> to vector<4x8x1xf32>
      %54 = arith.addf %51, %53 : vector<4x8x1xf32>
      %c0_30 = arith.constant 0 : index
      %c0_31 = arith.constant 0 : index
      %c0_32 = arith.constant 0 : index
      %55 = vector.load %arg8[%c0_30, %c0_31, %c0_32] : memref<4x8x1xf32, #tpu.memory_space<vmem>>, vector<4x8x1xf32>
      tpu.vector_store %arg8[%c0_30, %c0_31, %c0_32], %54 {strides = array<i32>} : memref<4x8x1xf32, #tpu.memory_space<vmem>>, vector<4x8x1xf32>,
      %c0_33 = arith.constant 0 : index
      %c0_34 = arith.constant 0 : index
      %c0_35 = arith.constant 0 : index
      %56 = vector.load %arg9[%c0_33, %c0_34, %c0_35] : memref<4x8x32xf32, #tpu.memory_space<vmem>>, vector<4x8x32xf32>
      %57 = vector.broadcast %46 : vector<4x8x1xf32> to vector<4x8x32xf32>
      %58 = arith.mulf %57, %56 : vector<4x8x32xf32>
      "tpu.trace_start"() <{level = 10 : i32, message = "hqk,hkd->hqd"}> : () -> ()
      %cst_36 = arith.constant dense<0.000000e+00> : vector<4x8x32xf32>
      %59 = tpu.matmul %49, %23, %cst_36 {dimension_numbers = #tpu.dot_dimension_numbers<[2], [1], [1], [2], [0, 0, 0, 1, 1, 2], [0], [0]>} : vector<4x8x8xf32>, vector<4x8x32xf32>, vector<4x8x32xf32> -> vector<4x8x32xf32>
      "tpu.trace_stop"() : () -> ()
      %60 = arith.addf %58, %59 : vector<4x8x32xf32>
      %c0_37 = arith.constant 0 : index
      %c0_38 = arith.constant 0 : index
      %c0_39 = arith.constant 0 : index
      %61 = vector.load %arg9[%c0_37, %c0_38, %c0_39] : memref<4x8x32xf32, #tpu.memory_space<vmem>>, vector<4x8x32xf32>
      tpu.vector_store %arg9[%c0_37, %c0_38, %c0_39], %60 {strides = array<i32>} : memref<4x8x32xf32, #tpu.memory_space<vmem>>, vector<4x8x32xf32>,
      %c0_40 = arith.constant 0 : index
      %c0_41 = arith.constant 0 : index
      %c0_42 = arith.constant 0 : index
      %62 = vector.load %arg7[%c0_40, %c0_41, %c0_42] : memref<4x8x1xf32, #tpu.memory_space<vmem>>, vector<4x8x1xf32>
      tpu.vector_store %arg7[%c0_40, %c0_41, %c0_42], %44 {strides = array<i32>} : memref<4x8x1xf32, #tpu.memory_space<vmem>>, vector<4x8x1xf32>,
    } else {
    }
    %c0_i32_5 = arith.constant 0 : i32
    %15 = arith.cmpi eq, %arg2, %c0_i32_5 : i32
    %16 = arith.extui %15 : i1 to i32
    %c0_i32_6 = arith.constant 0 : i32
    %17 = arith.cmpi ne, %16, %c0_i32_6 : i32
    scf.if %17 {
      %c0 = arith.constant 0 : index
      %c0_7 = arith.constant 0 : index
      %c0_8 = arith.constant 0 : index
      %18 = vector.load %arg8[%c0, %c0_7, %c0_8] : memref<4x8x1xf32, #tpu.memory_space<vmem>>, vector<4x8x1xf32>
      %cst = arith.constant 1.000000e+00 : f32
      %19 = vector.broadcast %cst : f32 to vector<4x8x1xf32>
      %20 = arith.divf %19, %18 : vector<4x8x1xf32>
      %c0_9 = arith.constant 0 : index
      %c0_10 = arith.constant 0 : index
      %c0_11 = arith.constant 0 : index
      %21 = vector.load %arg9[%c0_9, %c0_10, %c0_11] : memref<4x8x32xf32, #tpu.memory_space<vmem>>, vector<4x8x32xf32>
      %22 = vector.broadcast %20 : vector<4x8x1xf32> to vector<4x8x32xf32>
      %23 = arith.mulf %21, %22 : vector<4x8x32xf32>
      %c0_12 = arith.constant 0 : index
      %c0_13 = arith.constant 0 : index
      %c0_14 = arith.constant 0 : index
      %c0_15 = arith.constant 0 : index
      %24 = vector.load %arg6[%c0_12, %c0_13, %c0_14, %c0_15] : memref<1x4x8x32xf32, #tpu.memory_space<vmem>>, vector<1x4x8x32xf32>
      %25 = vector.shape_cast %24 : vector<1x4x8x32xf32> to vector<4x8x32xf32>
      %26 = vector.shape_cast %23 : vector<4x8x32xf32> to vector<1x4x8x32xf32>
      tpu.vector_store %arg6[%c0_12, %c0_13, %c0_14, %c0_15], %26 {strides = array<i32>} : memref<1x4x8x32xf32, #tpu.memory_space<vmem>>, vector<1x4x8x32xf32>,
    } else {
    }
    return
  }
  func.func @transform_0(%arg0: i32, %arg1: i32, %arg2: i32) -> (i32, i32, i32, i32) {
    %c0_i32 = arith.constant 0 : i32
    %c0_i32_0 = arith.constant 0 : i32
    %c0_i32_1 = arith.constant 0 : i32
    return %arg0, %c0_i32, %arg1, %c0_i32_0 : i32, i32, i32, i32
  }
  func.func @transform_1(%arg0: i32, %arg1: i32, %arg2: i32) -> (i32, i32, i32, i32) {
    %c0_i32 = arith.constant 0 : i32
    %c0_i32_0 = arith.constant 0 : i32
    %c0_i32_1 = arith.constant 0 : i32
    return %arg0, %c0_i32, %arg2, %c0_i32_0 : i32, i32, i32, i32
  }
  func.func @transform_2(%arg0: i32, %arg1: i32, %arg2: i32) -> (i32, i32, i32, i32) {
    %c0_i32 = arith.constant 0 : i32
    %c0_i32_0 = arith.constant 0 : i32
    %c0_i32_1 = arith.constant 0 : i32
    return %arg0, %c0_i32, %arg2, %c0_i32_0 : i32, i32, i32, i32
  }
  func.func @transform_3(%arg0: i32, %arg1: i32, %arg2: i32) -> (i32, i32, i32, i32) {
    %c0_i32 = arith.constant 0 : i32
    %c0_i32_0 = arith.constant 0 : i32
    %c0_i32_1 = arith.constant 0 : i32
    return %arg0, %c0_i32, %arg1, %c0_i32_0 : i32, i32, i32, i32
  }
}

</mosaic_0001>

<bundles_post_ra>
// kernel: tpu_custom_call.1
= control target key start
LH: loop header
LB: loop body
LE: loop exit
PB: predicated region body
PF: predicated region fallthrough
CT: control target
= control target key end

     0   :  { %s2777_s0 = inlined_call_operand.hbm [shape: f32[2,4,8,32], index: 0, kind: input, shape index: {}]   ;;  %s2778_s1 = inlined_call_operand.hbm [shape: f32[2,4,8,32], index: 1, kind: input, shape index: {}]   ;;  %s2779_s2 = inlined_call_operand.hbm [shape: f32[2,4,8,32], index: 2, kind: input, shape index: {}]   ;;  %s2780_s3 = inlined_call_operand.hbm [shape: f32[2,4,8,32], index: 3, kind: output, shape index: {}]  }
   0x1   :  { %2786 = sst [smem:[#allocation18_spill]] %s2778_s1 }
   0x2   :  { %8 = vsyncpa [#allocation6], 0 }
   0x3   :  { %10 = vsyncpa [#allocation6 + $0x1], 0 }
   0x4   :  { %11 = vsyncpa [#allocation9], 0 }
   0x5   :  { %13 = vsyncpa [#allocation9 + $0x1], 0 }
   0x6   :  { %14 = vsyncpa [#allocation7], 0 }
   0x7   :  { %16 = vsyncpa [#allocation7 + $0x1], 0  ;;  %s2449_s12 = smov 0   ;;  %s2451_s13 = smov 0  }
   0x8   :  { %s2453_s14 = smov 0   ;;  %s2455_s15 = smov 0  }
   0x9   :  { %s2457_s16 = smov 0   ;;  %s2459_s17 = smov 0  }
   0xa LB: > { %2787 = sst [smem:[#allocation15_spill]] %s2411_s16  ;;  %s2480_s18 = sadd.s32 4294967295, %s2415_s17   ;;  %s2415_s17 = sphi %s2459_s17, %s22_s17   ;;  %s2411_s16 = sphi %s2457_s16, %s2802_s16   ;;  %s2407_s15 = sphi %s2455_s15, %s2801_s15   ;;  %s2403_s14 = sphi %s2453_s14, %s2805_s14   ;;  %s2399_s13 = sphi %s2451_s13, %s2804_s13   ;;  %s2395_s12 = sphi %s2449_s12, %s2803_s12  }
   0xb   : > { %s2035_s19 = sadd.s32 4294967294, %s2415_s17   ;;  %s41_s20 = sadd.s32 1, %s2411_s16 }
   0xc   : > { %s50_s21 = sadd.s32 1, %s2403_s14  ;;  %p43_p0 = scmp.ge.s32.totalorder %s41_s20, 2 }
   0xd   : > { %p57_p1 = scmp.ne.s32.totalorder %s2403_s14, %s2399_s13  ;;  %p58_p2 = scmp.eq.s32.totalorder %s2415_s17, 0 }
   0xe   : > { %p63_p3 = scmp.ne.s32.totalorder %s2399_s13, %s2395_s12  ;;  %s2807_s20 = smov (%p43_p0, %s41_s20), 0 }
   0xf   : > { %2788 = sst [smem:[#allocation16_spill]] %s2807_s20  ;;  %p2492_p4 = por %p58_p2, %p57_p1 }
  0x10   : > { %p64_p5 = scmp.eq.s32.totalorder %s2480_s18, 0  ;;  %s45_s23 = ssub.s32 %s2411_s16, %s2807_s20 }
  0x11   : > { %p145_p6 = scmp.eq.s32.totalorder %s2480_s18, 1  ;;  %p48_p7 = scmp.eq.s32.totalorder %s45_s23, 0 }
  0x12   : > { %p2500_p8 = por %p64_p5, %p63_p3  ;;  %p151_p10 = scmp.eq.s32.totalorder %s2035_s19, 1 }
  0x13   : > { %p2504_p9 = por %p145_p6, %p57_p1  ;;  %p2163_p13 = scmp.lt.s32.totalorder %s2415_s17, 2 }
  0x14   : > { %s2509_s26 = scalar_select %p48_p7, %s2403_s14, %s50_s21  }
  0x15   : > { %p2511_p11 = por %p151_p10, %p63_p3  ;;  %s2781_s28 = sand.u32 1, %s2403_s14  }
  0x16   : > { %2792 = sst [smem:[#allocation17_spill]] %s2509_s26  ;;  %s2520_s29 = sshll.u32 %s2781_s28, 5 }
  0x17   : > { %s2523_s30 = sshll.u32 %s2411_s16, 9  ;;  %p2527_p0 = pnand %p2163_p13, %p2492_p4 }
  0x18   : > { %s193_s5 = sand.u32 1, %s2415_s17   ;;  %s2795_s1 = sld [smem:[#allocation18_spill]] }
  0x19   : > { %s197_s9 = scalar_lea.vmem [#allocation8], %s2520_s29  ;;  %p2047_p1 = scmp.ge.s32.totalorder %s2415_s17, 1 }
  0x1a   : > { %s205_s10 = sshll.u32 %s197_s9, 4  ;;  %p235_p2 = scmp.lt.s32.totalorder %s2415_s17, 3  ;;  %s206_s10 = int_to_ptr.vmem [resolvable:$true] %s205_s10 }
  0x1b   : > { %s2539_s11 = scalar_lea.sflag [#allocation9], %s193_s5  ;;  %p2249_p3 = pneg %p2527_p0 }
  0x1c   : > { %s2260_s19 = scalar_lea.vmem %s206_s10, 512  ;;  %s2417_s21 = smov [#allocation8]  }
  0x1d   : > { %p2261_p4 = scmp.ne.s32.totalorder %s206_s10, %s2260_s19  ;;  %s2265_s22 = sshll.u32 %s2417_s21, 4  ;;  %s2266_s22 = int_to_ptr.vmem [resolvable:$false] %s2265_s22 }
  0x1e   : > { %s204_s8 = scalar_lea.hbm %s2795_s1, %s2523_s30  ;;  %s2267_s23 = scalar_lea.vmem %s2266_s22, 1024 }
  0x1f   : > { %p2263_p5 = pnand %p2261_p4, %p2249_p3  ;;  %p2268_p7 = scmp.lt.s32.totalorder %s206_s10, %s2266_s22 }
  0x20   : > { %p2269_p10 = scmp.lt.s32.totalorder %s2267_s23, %s2260_s19 }
  0x21   : > { %p2264_p6 = pneg %p2263_p5 }
  0x22   : > { %p2270_p13 = por %p2269_p10, %p2268_p7 }
  0x24   : > { %p2271_p12 = pnand %p2270_p13, %p2264_p6 }
  0x26   : > { %2274 = shalt.err (!%p2271_p12)
}
  0x27   : > { %s2784_s6 = smov 128   ;;  %s2419_s5 = smov 8  }
  0x28   : > { %2155 = dma.hbm_to_vmem [thread:$0]  (!%p2527_p0), %s204_s8, 512, %s206_s10, %s2539_s11, %s2784_s6, %s2784_s6, %s2419_s5  }
  0x29   : > { %p2556_p4 = pnand %p2047_p1, %p235_p2  ;;  %s182_s21 = scalar_lea.hbm %s2777_s0, %s2523_s30 }
  0x2a   : > { %s175_s22 = scalar_lea.vmem [#allocation5], %s2520_s29  ;;  %s226_s20 = scalar_lea.hbm %s2779_s2, %s2523_s30 }
  0x2b   : > { %s183_s23 = sshll.u32 %s175_s22, 4  ;;  %s2797_s16 = sand.u32 1, %s2403_s14   ;;  %s184_s23 = int_to_ptr.vmem [resolvable:$true] %s183_s23 }
  0x2c   : > { %s172_s26 = scalar_lea.sflag [#allocation6], %s2797_s16  ;;  %s2288_s8 = scalar_lea.vmem %s184_s23, 512 }
  0x2d   : > { %p2289_p12 = scmp.ne.s32.totalorder %s184_s23, %s2288_s8  ;;  %s2420_s10 = smov [#allocation5]  }
  0x2e   : > { %s2293_s6 = sshll.u32 %s2420_s10, 4  ;;  %s2294_s6 = int_to_ptr.vmem [resolvable:$false] %s2293_s6 }
  0x2f   : > { %p2291_p1 = pnand %p2289_p12, %p2249_p3  ;;  %s2295_s9 = scalar_lea.vmem %s2294_s6, 1024 }
  0x30   : > { %p2296_p5 = scmp.lt.s32.totalorder %s184_s23, %s2294_s6  ;;  %p2297_p6 = scmp.lt.s32.totalorder %s2295_s9, %s2288_s8 }
  0x31   : > { %p2292_p2 = pneg %p2291_p1 }
  0x32   : > { %p2298_p7 = por %p2297_p6, %p2296_p5 }
  0x34   : > { %p2299_p10 = pnand %p2298_p7, %p2292_p2 }
  0x36   : > { %2302 = shalt.err (!%p2299_p10)
}
  0x37   : > { %s2798_s1 = smov 128   ;;  %s219_s16 = scalar_lea.vmem [#allocation10], %s2520_s29 }
  0x38   : > { %2152 = dma.hbm_to_vmem [thread:$0]  (!%p2527_p0), %s182_s21, 512, %s184_s23, %s172_s26, %s2798_s1, %s2798_s1, %s2419_s5  }
  0x39   : > { %s227_s28 = sshll.u32 %s219_s16, 4  ;;  %s2421_s6 = smov [#allocation10]   ;;  %s228_s28 = int_to_ptr.vmem [resolvable:$true] %s227_s28 }
  0x3a   : > { %s2316_s19 = scalar_lea.vmem %s228_s28, 512  ;;  %s2321_s22 = sshll.u32 %s2421_s6, 4  ;;  %s2322_s22 = int_to_ptr.vmem [resolvable:$false] %s2321_s22 }
  0x3b   : > { %p2317_p13 = scmp.ne.s32.totalorder %s228_s28, %s2316_s19  ;;  %s2323_s8 = scalar_lea.vmem %s2322_s22, 1024 }
  0x3c   : > { %p2324_p2 = scmp.lt.s32.totalorder %s228_s28, %s2322_s22  ;;  %p2325_p5 = scmp.lt.s32.totalorder %s2323_s8, %s2316_s19 }
  0x3d   : > { %p2319_p12 = pnand %p2317_p13, %p2249_p3 }
  0x3e   : > { %p2326_p6 = por %p2325_p5, %p2324_p2 }
  0x3f   : > { %p2320_p1 = pneg %p2319_p12 }
  0x41   : > { %p2327_p7 = pnand %p2326_p6, %p2320_p1 }
  0x43   : > { %2330 = shalt.err (!%p2327_p7)
}
  0x44   : > { %2158 = dma.hbm_to_vmem [thread:$0]  (!%p2527_p0), %s226_s20, 512, %s228_s28, %s2539_s11, %s2798_s1, %s2798_s1, %s2419_s5  }
  0x45   : > { %239 = sbr.rel (%p2556_p4) target bundleno = 878 (0x36e), region = 32  ;;  %s2597_s21 = sand.u32 (!%p2556_p4), 1, %s2399_s13  }
  0x46   : > { %s2600_s4 = sshll.u32 (!%p2556_p4), %s2597_s21, 5  ;;  %s242_s23 = scalar_lea.sflag (!%p2556_p4), [#allocation6], %s2597_s21 }
  0x47   : > { %s2604_s10 = scalar_lea.vmem (!%p2556_p4), [#allocation5], %s2600_s4 }
  0x4a   : > { %2382 = dma.done.wait (%p2500_p8), %s242_s23, 512  }
  0x4b   : > { %2384 = vsyncadd (%p2500_p8), %s242_s23, 4294966784  ;;  %s250_s20 = sand.u32 1, %s2480_s18   ;;  %s254_s11 = scalar_lea.vmem [#allocation8], %s2600_s4 }
  0x4c   : > { %s251_s30 = scalar_lea.sflag [#allocation9], %s250_s20 }
  0x4d   : > { %2386 = dma.done.wait (%p2500_p8), %s251_s30, 1024  }
  0x4e   : > { %2388 = vsyncadd (%p2500_p8), %s251_s30, 4294966272  ;;  %vm309_vm0 = vcmask 261120   ;;  %v2422_v0 = vmov 0.0   ;;  %vm2423_vm1 = vmmov 0   ;;  %v1078_v1 = vld [vmem:[%s254_s11] sm:$0xff]  ;;  %v1079_v2 = vld [vmem:[%s254_s11 + $0x8] sm:$0xff]  ;;  %v1395_v10 = vlaneseq }
  0x4f   : > { %2101 = vmatprep.subr.mxu0 %v2422_v0  ;;  %310 = vst.msk [vmem:[#allocation4] sm:$0xff] %vm309_vm0, %v2422_v0  ;;  %311 = vst.msk [vmem:[#allocation4 + $0x8] sm:$0xff] %vm309_vm0, %v2422_v0  ;;  %2106 = vmatprep.subr.mxu1 %v2422_v0  ;;  %v1074_v3 = vld [vmem:[%s2604_s10] sm:$0xff]  ;;  %v1075_v4 = vld [vmem:[%s2604_s10 + $0x8] sm:$0xff]  ;;  %vm300_vm2 = vcmask 7168   ;;  %vm1414_vm4 = vcmask 64512  }
  0x50   : > { %312 = vst.msk [vmem:[#allocation4 + $0x10] sm:$0xff] %vm309_vm0, %v2422_v0  ;;  %313 = vst.msk [vmem:[#allocation4 + $0x18] sm:$0xff] %vm309_vm0, %v2422_v0  ;;  %2103 = vmatprep.mubr.msk.f32.mxu0 %vm2423_vm1, %v2422_v0  ;;  %2108 = vmatprep.mubr.msk.f32.mxu1 %vm2423_vm1, %v2422_v0  ;;  %v1080_v5 = vld [vmem:[%s254_s11 + $0x10] sm:$0xff]  ;;  %v1081_v6 = vld [vmem:[%s254_s11 + $0x18] sm:$0xff]  ;;  %v2424_v9 = vmov -2.3819763e+38  }
  0x51   : > { %2102 = vmatpush3.xpose.msk.msra.mxu0 %vm309_vm0, %v1078_v1  ;;  %2107 = vmatpush3.xpose.msk.msra.mxu1 %vm309_vm0, %v1079_v2  ;;  %v1076_v7 = vld [vmem:[%s2604_s10 + $0x10] sm:$0xff]  ;;  %v1077_v8 = vld [vmem:[%s2604_s10 + $0x18] sm:$0xff]  ;;  %301 = vst.msk [vmem:[#allocation2] sm:$0xff] %vm300_vm2, %v2424_v9  ;;  %302 = vst.msk [vmem:[#allocation2 + $0x8] sm:$0xff] %vm300_vm2, %v2424_v9  ;;  %v1396_v11 = vshrl.u32 %v1395_v10, 7  ;;  %v1400_v12 = vand.u32 127, %v1395_v10 }
  0x52   : > { %2111 = vmatprep.subr.mxu0 %v2422_v0  ;;  %2116 = vmatprep.subr.mxu1 %v2422_v0  ;;  %303 = vst.msk [vmem:[#allocation2 + $0x10] sm:$0xff] %vm300_vm2, %v2424_v9  ;;  %304 = vst.msk [vmem:[#allocation2 + $0x18] sm:$0xff] %vm300_vm2, %v2424_v9  ;;  %v2425_v33 = vmov 0   ;;  %s263_s18 = scalar_lea.vmem [#allocation10], %s2600_s4  ;;  %s295_s24 = scalar_lea.vmem [#allocation11], %s2600_s4 }
  0x53   : > { %305 = vst.msk [vmem:[#allocation3] sm:$0xff] %vm300_vm2, %v2422_v0  ;;  %306 = vst.msk [vmem:[#allocation3 + $0x8] sm:$0xff] %vm300_vm2, %v2422_v0  ;;  %vm1403_vm3 = vcmp.le.s32.totalorder %v1400_v12, %v1396_v11  ;;  %2221 = vset.pattern.permute.xlu0 %v2425_v33  ;;  %2222 = vset.pattern.permute.xlu1 %v2425_v33  ;;  %v1082_v50 = vld [vmem:[%s263_s18] sm:$0xff]  ;;  %v1083_v51 = vld [vmem:[%s263_s18 + $0x8] sm:$0xff]  ;;  %s1899_s5 = sshll.u32 %s295_s24, 4  ;;  %s2084_s7 = sshll.u32 %s2407_s15, 9  ;;  %s2722_s5 = int_to_ptr.vmem [resolvable:$true] %s1899_s5 }
  0x54   : > { %2104 = vmatmul.mubr.msk.f32.vlgmr.msra.gmra.mxu0 %vm309_vm0, %v1074_v3  ;;  %2109 = vmatmul.mubr.msk.f32.vlgmr.msra.gmra.mxu1 %vm309_vm0, %v1075_v4  ;;  %307 = vst.msk [vmem:[#allocation3 + $0x10] sm:$0xff] %vm300_vm2, %v2422_v0  ;;  %308 = vst.msk [vmem:[#allocation3 + $0x18] sm:$0xff] %vm300_vm2, %v2422_v0  ;;  %v1084_v1 = vld [vmem:[%s263_s18 + $0x10] sm:$0xff]  ;;  %v1085_v4 = vld [vmem:[%s263_s18 + $0x18] sm:$0xff]  ;;  %s2728_s16 = scalar_lea.hbm %s2780_s3, %s2084_s7  ;;  %s1885_s28 = scalar_lea.sflag [#allocation7], %s2597_s21 }
  0x55   : > { %2112 = vmatpush3.xpose.msk.msra.mxu0 %vm309_vm0, %v1080_v5  ;;  %2113 = vmatprep.mubr.msk.f32.mxu0 %vm2423_vm1, %v2422_v0  ;;  %s2331_s19 = scalar_lea.vmem %s2722_s5, 512  ;;  %s2426_s15 = smov [#allocation11]  }
  0x56   : > { %2117 = vmatpush3.xpose.msk.msra.mxu1 %vm309_vm0, %v1081_v6  ;;  %2118 = vmatprep.mubr.msk.f32.mxu1 %vm2423_vm1, %v2422_v0  ;;  %p2332_p8 = scmp.ne.s32.totalorder %s2722_s5, %s2331_s19  ;;  %s2335_s6 = sshll.u32 %s2426_s15, 4  ;;  %s2336_s6 = int_to_ptr.vmem [resolvable:$false] %s2335_s6 }
  0x57   : > { %2121 = vmatprep.subr.mxu0 %v2422_v0  ;;  %2126 = vmatprep.subr.mxu1 %v2422_v0  ;;  %s2337_s22 = scalar_lea.vmem %s2336_s6, 1024  ;;  %p2338_p4 = scmp.lt.s32.totalorder %s2722_s5, %s2336_s6 }
  0x58   : > { %2114 = vmatmul.mubr.msk.f32.vlgmr.msra.gmra.mxu0 %vm309_vm0, %v1076_v7  ;;  %v2674_v34 = vld [vmem:[#allocation2] sm:$0xff]  ;;  %v1411_v37 = vld [vmem:[#allocation2 + $0x8] sm:$0xff]  ;;  %p2333_p0 = pnand %p2332_p8, %p2504_p9  ;;  %p2339_p10 = scmp.lt.s32.totalorder %s2337_s22, %s2331_s19 }
  0x59   : > { %2119 = vmatmul.mubr.msk.f32.vlgmr.msra.gmra.mxu1 %vm309_vm0, %v1077_v8  ;;  %2123 = vmatprep.mubr.msk.f32.mxu0 %vm2423_vm1, %v2422_v0  ;;  %v2679_v38 = vld [vmem:[#allocation2 + $0x10] sm:$0xff]  ;;  %v2687_v44 = vld [vmem:[#allocation2 + $0x18] sm:$0xff] }
  0x5a   : > { %2128 = vmatprep.mubr.msk.f32.mxu1 %vm2423_vm1, %v2422_v0  ;;  %2122 = vmatpush3.msra.mxu0 %v1082_v50  ;;  %p2334_p3 = pneg %p2333_p0  ;;  %p2340_p13 = por %p2339_p10, %p2338_p4 }
  0x5b   : > { %2131 = vmatprep.subr.mxu0 %v2422_v0  ;;  %2127 = vmatpush3.msra.mxu1 %v1083_v51 }
  0x5c   : > { %2136 = vmatprep.subr.mxu1 %v2422_v0  ;;  %p2341_p12 = pnand %p2340_p13, %p2334_p3 }
 0x114   : > { %v1159_v13 = vpop.f32.mrf.mxu0  ;;  %v1235_v14 = vpop.f32.mrf.mxu1 }
 0x115   : > { %v1391_v15 = vmul.f32 0.17677669, %v1159_v13  ;;  %v1392_v16 = vmul.f32 0.17677669, %v1235_v14 }
 0x116   : > { %v2105_v17 = vpop.f32.mrf.mxu0  ;;  %v2110_v18 = vpop.f32.mrf.mxu1 }
 0x117   : > { %v1406_v19 = vsel %vm1403_vm3, %v1391_v15, -2.3819763e+38  ;;  %v1407_v20 = vsel %vm1403_vm3, %v1392_v16, -2.3819763e+38  ;;  %v1475_v18 = vld [vmem:[#allocation3] sm:$0xff] }
 0x118   : > { %v1415_v21 = vsel %vm1414_vm4, %v1406_v19, -inf  ;;  %v1311_v22 = vpop.f32.mrf.mxu0  ;;  %v1418_v26 = vsel %vm1414_vm4, %v1407_v20, -inf }
 0x119   : > { %1416 = vmax.xlane.f32.xlu0 %v1415_v21  ;;  %v1393_v23 = vmul.f32 0.17677669, %v1311_v22  ;;  %v1387_v24 = vpop.f32.mrf.mxu1  ;;  %v1476_v21 = vld [vmem:[#allocation3 + $0x8] sm:$0xff] }
 0x11a   : > { %v2115_v25 = vpop.f32.mrf.mxu0  ;;  %v1394_v27 = vmul.f32 0.17677669, %v1387_v24 }
 0x11b   : > { %v2120_v28 = vpop.f32.mrf.mxu1  ;;  %v1408_v29 = vsel %vm1403_vm3, %v1393_v23, -2.3819763e+38  ;;  %v1477_v25 = vld [vmem:[#allocation3 + $0x10] sm:$0xff] }
 0x11c   : > { %v1421_v30 = vsel %vm1414_vm4, %v1408_v29, -inf  ;;  %v1409_v31 = vsel %vm1403_vm3, %v1394_v27, -2.3819763e+38 }
 0x11d   : > { %1419 = vmax.xlane.f32.xlu0 %v1418_v26  ;;  %1422 = vmax.xlane.f32.xlu1 %v1421_v30  ;;  %v1424_v32 = vsel %vm1414_vm4, %v1409_v31, -inf }
 0x121   : > { %1425 = vmax.xlane.f32.xlu1 %v1424_v32 }
 0x1a2   : > { %v1417_v35 = vpop.xlane.xlu0 %1416 }
 0x1a3   : > { %v2677_v36 = vmax.f32 %v2674_v34, %v1417_v35 }
 0x1a5   : > { %v1431_v39 = vsub.f32 %v2674_v34, %v2677_v36  ;;  %1832 = vst.msk [vmem:[#allocation2] sm:$0xff] %vm300_vm2, %v2677_v36  ;;  %1445 = vperm.xlu0 %2221, %v2677_v36  }
 0x1a6   : > { %v1420_v40 = vpop.xlane.xlu0 %1419  ;;  %v1423_v41 = vpop.xlane.xlu1 %1422 }
 0x1a7   : > { %v1428_v42 = vmax.f32 %v1411_v37, %v1420_v40  ;;  %v1429_v43 = vmax.f32 %v2679_v38, %v1423_v41  ;;  %v1435_v11 = vmul.f32 1.442695, %v1431_v39 }
 0x1a9   : > { %v1432_v45 = vsub.f32 %v1411_v37, %v1428_v42  ;;  %1833 = vst.msk [vmem:[#allocation2 + $0x8] sm:$0xff] %vm300_vm2, %v1428_v42  ;;  %1450 = vperm.xlu1 %2222, %v1428_v42   ;;  %v1433_v46 = vsub.f32 %v2679_v38, %v1429_v43  ;;  %1834 = vst.msk [vmem:[#allocation2 + $0x10] sm:$0xff] %vm300_vm2, %v1429_v43  ;;  %v1504_v42 = vld [vmem:[#allocation4] sm:$0xff] }
 0x1aa   : > { %v1426_v47 = vpop.xlane.xlu1 %1425 }
 0x1ab   : > { %v1430_v48 = vmax.f32 %v2687_v44, %v1426_v47  ;;  %v1437_v9 = vmul.f32 1.442695, %v1432_v45  ;;  %v1439_v13 = vmul.f32 1.442695, %v1433_v46  ;;  %v1505_v45 = vld [vmem:[#allocation4 + $0x8] sm:$0xff] }
 0x1ad   : > { %1455 = vperm.xlu1 %2222, %v1429_v43   ;;  %v1434_v49 = vsub.f32 %v2687_v44, %v1430_v48  ;;  %1835 = vst.msk [vmem:[#allocation2 + $0x18] sm:$0xff] %vm300_vm2, %v1430_v48 }
 0x1af   : > { %v1441_v14 = vmul.f32 1.442695, %v1434_v49 }
 0x1b1   : > { %1460 = vperm.xlu1 %2222, %v1430_v48  }
 0x220   : > { %v1446_v52 = vpop.permute.xlu0 %1445 }
 0x221   : > { %v1463_v53 = vsub.f32 %v1406_v19, %v1446_v52  ;;  %v1506_v52 = vld [vmem:[#allocation4 + $0x10] sm:$0xff] }
 0x223   : > { %v1467_v54 = vmul.f32 1.442695, %v1463_v53 }
 0x224   : > { %v1451_v55 = vpop.permute.xlu1 %1450 }
 0x225   : > { %2223 = vpow2.f32 %v1467_v54  ;;  %v1464_v56 = vsub.f32 %v1407_v20, %v1451_v55 }
 0x227   : > { %v1469_v57 = vmul.f32 1.442695, %v1464_v56 }
 0x228   : > { %v1456_v58 = vpop.permute.xlu1 %1455 }
 0x229   : > { %2225 = vpow2.f32 %v1469_v57  ;;  %v1465_v59 = vsub.f32 %v1408_v29, %v1456_v58  ;;  %v1478_v29 = vld [vmem:[#allocation3 + $0x18] sm:$0xff] }
 0x22a   : > { %v1507_v57 = vld [vmem:[#allocation4 + $0x18] sm:$0xff] }
 0x22b   : > { %v1471_v60 = vmul.f32 1.442695, %v1465_v59 }
 0x22c   : > { %v1461_v61 = vpop.permute.xlu1 %1460 }
 0x22d   : > { %2227 = vpow2.f32 %v1471_v60  ;;  %v1466_v62 = vsub.f32 %v1409_v31, %v1461_v61 }
 0x22f   : > { %v1473_v63 = vmul.f32 1.442695, %v1466_v62 }
 0x231   : > { %2229 = vpow2.f32 %v1473_v63 }
 0x232   : > { %v2224_v2 = vpop.eup %2223  ;;  %2231 = vpow2.f32 %v1437_v9 }
 0x233   : > { %2124 = vmatmul.mubr.msk.f32.vlgmr.msra.gmra.mxu0 %vm1414_vm4, %v2224_v2  ;;  %v1483_v3 = vsel %vm1414_vm4, %v2224_v2, 0.0  ;;  %2233 = vpow2.f32 %v1435_v11 }
 0x234   : > { %1484 = vadd.xlane.f32.xlu1 %v1483_v3  ;;  %2132 = vmatpush3.msra.mxu0 %v1084_v1  ;;  %2235 = vpow2.f32 %v1439_v13 }
 0x235   : > { %2133 = vmatprep.mubr.msk.f32.mxu0 %vm2423_vm1, %v2422_v0  ;;  %2237 = vpow2.f32 %v1441_v14 }
 0x236   : > { %v2226_v5 = vpop.eup %2225 }
 0x237   : > { %2129 = vmatmul.mubr.msk.f32.vlgmr.msra.gmra.mxu1 %vm1414_vm4, %v2226_v5  ;;  %v1486_v6 = vsel %vm1414_vm4, %v2226_v5, 0.0 }
 0x238   : > { %1487 = vadd.xlane.f32.xlu0 %v1486_v6  ;;  %2137 = vmatpush3.msra.mxu1 %v1085_v4 }
 0x239   : > { %2138 = vmatprep.mubr.msk.f32.mxu1 %vm2423_vm1, %v2422_v0 }
 0x23a   : > { %v2228_v7 = vpop.eup %2227 }
 0x23b   : > { %2134 = vmatmul.mubr.msk.f32.vlgmr.msra.gmra.mxu0 %vm1414_vm4, %v2228_v7  ;;  %v1489_v8 = vsel %vm1414_vm4, %v2228_v7, 0.0 }
 0x23c   : > { %1490 = vadd.xlane.f32.xlu1 %v1489_v8 }
 0x23e   : > { %v2230_v10 = vpop.eup %2229 }
 0x23f   : > { %2139 = vmatmul.mubr.msk.f32.vlgmr.msra.gmra.mxu1 %vm1414_vm4, %v2230_v10  ;;  %v1492_v12 = vsel %vm1414_vm4, %v2230_v10, 0.0  ;;  %v2232_v0 = vpop.eup %2231 }
 0x240   : > { %1493 = vadd.xlane.f32.xlu1 %v1492_v12  ;;  %v2234_v15 = vpop.eup %2233  ;;  %v1480_v23 = vmul.f32 %v2232_v0, %v1476_v21 }
 0x241   : > { %v2236_v16 = vpop.eup %2235  ;;  %v1479_v19 = vmul.f32 %v2234_v15, %v1475_v18 }
 0x242   : > { %v2238_v17 = vpop.eup %2237  ;;  %v1481_v27 = vmul.f32 %v2236_v16, %v1477_v25 }
 0x243   : > { %v1482_v32 = vmul.f32 %v2238_v17, %v1478_v29 }
 0x24e   : > { %1515 = vperm.xlu0 %2221, %v2232_v0  }
 0x251   : > { %1510 = vperm.xlu1 %2222, %v2234_v15  }
 0x255   : > { %1520 = vperm.xlu1 %2222, %v2236_v16  }
 0x259   : > { %1525 = vperm.xlu1 %2222, %v2238_v17  }
 0x2bd   : > { %v1485_v20 = vpop.xlane.xlu1 %1484 }
 0x2be   : > { %v1495_v22 = vadd.f32 %v1485_v20, %v1479_v19 }
 0x2c0   : > { %1500 = vst.msk [vmem:[#allocation3] sm:$0xff] %vm300_vm2, %v1495_v22 }
 0x2c1   : > { %v1488_v24 = vpop.xlane.xlu0 %1487 }
 0x2c2   : > { %v1496_v26 = vadd.f32 %v1488_v24, %v1480_v23 }
 0x2c4   : > { %1501 = vst.msk [vmem:[#allocation3 + $0x8] sm:$0xff] %vm300_vm2, %v1496_v26 }
 0x2c5   : > { %v1491_v28 = vpop.xlane.xlu1 %1490 }
 0x2c6   : > { %v1497_v30 = vadd.f32 %v1491_v28, %v1481_v27 }
 0x2c7   : > { %v1839_v31 = vld [vmem:[#allocation3] sm:$0xff] }
 0x2c8   : > { %1502 = vst.msk [vmem:[#allocation3 + $0x10] sm:$0xff] %vm300_vm2, %v1497_v30  ;;  %2239 = vrcp.f32 %v1839_v31 }
 0x2c9   : > { %v1494_v33 = vpop.xlane.xlu1 %1493  ;;  %v1516_v46 = vpop.permute.xlu0 %1515 }
 0x2ca   : > { %v1498_v34 = vadd.f32 %v1494_v33, %v1482_v32  ;;  %v1529_v51 = vmul.f32 %v1516_v46, %v1505_v45 }
 0x2cb   : > { %v1840_v35 = vld [vmem:[#allocation3 + $0x8] sm:$0xff] }
 0x2cc   : > { %1503 = vst.msk [vmem:[#allocation3 + $0x18] sm:$0xff] %vm300_vm2, %v1498_v34  ;;  %2241 = vrcp.f32 %v1840_v35 }
 0x2cd   : > { %v1511_v43 = vpop.permute.xlu1 %1510 }
 0x2ce   : > { %v1528_v44 = vmul.f32 %v1511_v43, %v1504_v42 }
 0x2cf   : > { %v1841_v36 = vld [vmem:[#allocation3 + $0x10] sm:$0xff] }
 0x2d0   : > { %2243 = vrcp.f32 %v1841_v36 }
 0x2d1   : > { %v1521_v49 = vpop.permute.xlu1 %1520 }
 0x2d2   : > { %v1530_v56 = vmul.f32 %v1521_v49, %v1506_v52 }
 0x2d3   : > { %v1842_v37 = vld [vmem:[#allocation3 + $0x18] sm:$0xff] }
 0x2d4   : > { %2245 = vrcp.f32 %v1842_v37 }
 0x2d5   : > { %v2240_v38 = vpop.eup %2239  ;;  %v1526_v58 = vpop.permute.xlu1 %1525 }
 0x2d6   : > { %1857 = vperm.xlu1 %2222, %v2240_v38   ;;  %v1531_v62 = vmul.f32 %v1526_v58, %v1507_v57 }
 0x2d9   : > { %v2242_v39 = vpop.eup %2241 }
 0x2da   : > { %1862 = vperm.xlu0 %2221, %v2242_v39  }
 0x2dd   : > { %v2244_v40 = vpop.eup %2243 }
 0x2de   : > { %1867 = vperm.xlu1 %2222, %v2244_v40  }
 0x2e1   : > { %v2246_v41 = vpop.eup %2245 }
 0x2e2   : > { %1872 = vperm.xlu0 %2221, %v2246_v41  }
 0x2f3   : > { %v1601_v47 = vpop.f32.mrf.mxu0 }
 0x2f4   : > { %v1824_v48 = vadd.f32 %v1601_v47, %v1528_v44 }
 0x2f5   : > { %v2125_v50 = vpop.f32.mrf.mxu0 }
 0x2f6   : > { %1828 = vst.msk [vmem:[#allocation4] sm:$0xff] %vm309_vm0, %v1824_v48 }
 0x2f7   : > { %v1674_v53 = vpop.f32.mrf.mxu1 }
 0x2f8   : > { %v1825_v54 = vadd.f32 %v1674_v53, %v1529_v51 }
 0x2f9   : > { %v2130_v55 = vpop.f32.mrf.mxu1 }
 0x2fa   : > { %1829 = vst.msk [vmem:[#allocation4 + $0x8] sm:$0xff] %vm309_vm0, %v1825_v54 }
 0x2fb   : > { %v1747_v59 = vpop.f32.mrf.mxu0 }
 0x2fc   : > { %v1826_v60 = vadd.f32 %v1747_v59, %v1530_v56 }
 0x2fd   : > { %v2135_v61 = vpop.f32.mrf.mxu0  ;;  %v1851_v3 = vld [vmem:[#allocation4] sm:$0xff] }
 0x2fe   : > { %1830 = vst.msk [vmem:[#allocation4 + $0x10] sm:$0xff] %vm309_vm0, %v1826_v60 }
 0x2ff   : > { %v1820_v63 = vpop.f32.mrf.mxu1 }
 0x300   : > { %v1827_v1 = vadd.f32 %v1820_v63, %v1531_v62 }
 0x301   : > { %v2140_v2 = vpop.f32.mrf.mxu1  ;;  %v1852_v6 = vld [vmem:[#allocation4 + $0x8] sm:$0xff] }
 0x302   : > { %1831 = vst.msk [vmem:[#allocation4 + $0x18] sm:$0xff] %vm309_vm0, %v1827_v1 }
 0x305   : > { %v1853_v9 = vld [vmem:[#allocation4 + $0x10] sm:$0xff] }
 0x309   : > { %v1854_v13 = vld [vmem:[#allocation4 + $0x18] sm:$0xff] }
 0x351   : > { %v1858_v4 = vpop.permute.xlu1 %1857 }
 0x352   : > { %v1875_v5 = vmul.f32 %v1858_v4, %v1851_v3 }
 0x354   : > { %1880 = vst.msk [vmem:[%s295_s24] sm:$0xff] %vm309_vm0, %v1875_v5 }
 0x355   : > { %v1863_v7 = vpop.permute.xlu0 %1862 }
 0x356   : > { %v1876_v8 = vmul.f32 %v1863_v7, %v1852_v6 }
 0x358   : > { %1881 = vst.msk [vmem:[%s295_s24 + $0x8] sm:$0xff] %vm309_vm0, %v1876_v8 }
 0x359   : > { %v1868_v10 = vpop.permute.xlu1 %1867 }
 0x35a   : > { %v1877_v11 = vmul.f32 %v1868_v10, %v1853_v9 }
 0x35c   : > { %1882 = vst.msk [vmem:[%s295_s24 + $0x10] sm:$0xff] %vm309_vm0, %v1877_v11 }
 0x35d   : > { %v1873_v12 = vpop.permute.xlu0 %1872 }
 0x35e   : > { %v1878_v14 = vmul.f32 %v1873_v12, %v1854_v13 }
 0x360   : > { %1883 = vst.msk [vmem:[%s295_s24 + $0x18] sm:$0xff] %vm309_vm0, %v1878_v14 }
 0x361   : > { %2344 = shalt.err (!%p2341_p12)
}
 0x362   : > { %s2345_s8 = scalar_lea.hbm %s2728_s16, 512  ;;  %s2349_s4 = scalar_lea.hbm %s2780_s3, 1024 }
 0x363   : > { %p2346_p1 = scmp.ne.s32.totalorder %s2728_s16, %s2345_s8  ;;  %p2350_p6 = scmp.lt.s32.totalorder %s2728_s16, %s2780_s3 }
 0x364   : > { %p2351_p7 = scmp.lt.s32.totalorder %s2349_s4, %s2345_s8 }
 0x365   : > { %p2347_p2 = pnand %p2346_p1, %p2504_p9 }
 0x366   : > { %p2352_p8 = por %p2351_p7, %p2350_p6 }
 0x367   : > { %p2348_p5 = pneg %p2347_p2 }
 0x369   : > { %p2353_p0 = pnand %p2352_p8, %p2348_p5 }
 0x36b   : > { %2356 = shalt.err (!%p2353_p0)
}
 0x36c   : > { %s2427_s20 = smov 128   ;;  %s2428_s30 = smov 8  }
 0x36d   : > { %2147 = dma.vmem_to_hbm [thread:$0]  (%p2504_p9), %s2722_s5, 512, %s2728_s16, %s1885_s28, %s2427_s20, %s2427_s20, %s2428_s30  }
 0x36e PF: > { %s1914_s11 = sand.u32 1, %s2395_s12   ;;  %p2799_p3 = scmp.ge.s32.totalorder %s2415_s17, 2 }
 0x36f   : > { %s1915_s18 = scalar_lea.sflag [#allocation7], %s1914_s11 }
 0x370   : > { %p2160_p4 = pnand %p2799_p3, %p2511_p11 }
 0x372   : > { %p2161_p10 = pneg %p2160_p4 }
 0x374   : > { %2390 = dma.done.wait (%p2161_p10), %s1915_s18, 512  }
 0x375   : > { %2392 = vsyncadd (%p2161_p10), %s1915_s18, 4294966784  ;;  %s22_s17 = sadd.s32 1, %s2415_s17   ;;  %s2800_s25 = sld [smem:[#allocation17_spill]] }
 0x376   : > { %p19_p13 = scmp.ge.s32.totalorder %s22_s17, 4   ;;  %s2801_s15 = sld [smem:[#allocation15_spill]] }
 0x377   : > { %s2802_s16 = sld [smem:[#allocation16_spill]]  ;;  %s2803_s12 = smov %s2399_s13 }
 0x378   : > { %s2804_s13 = smov %s2403_s14  ;;  %21 = sbr.rel (!%p19_p13) target bundleno = 10 (0xa), region = 117 }
 0x37b   : > { %s2805_s14 = smov %s2800_s25 }
 0x37d   :  { %1920 = vsyncpa [#allocation6], 1 }
 0x37e   :  { %1922 = vsyncpa [#allocation6 + $0x1], 1 }
 0x37f   :  { %1923 = vsyncpa [#allocation9], 1 }
 0x380   :  { %1925 = vsyncpa [#allocation9 + $0x1], 1 }
 0x381   :  { %1926 = vsyncpa [#allocation7], 1 }
 0x382   :  { %1928 = vsyncpa [#allocation7 + $0x1], 1 }

</bundles_post_ra>
